<compile_context>
chip_gen: v5e
topology: v5e:2x2
jax: 0.10.0
libtpu: 0.0.40
codegen_flags: <defaults>
</compile_context>

<pallas_src>
import functools
import math

import numpy as np

import jax
import jax.numpy as jnp
from jax.experimental import pallas as pl
from jax.experimental.pallas import tpu as pltpu


def _pos_embed_kernel(inv_dim_t_ref, phase_ref, plane_ref, out_ref, tile_ref):
    """One (half, spatial-tile, batch) grid step.

    inv_dim_t_ref : (npf, 1)   per-channel 1/dim_t
    phase_ref     : (npf, 1)   0 for even channels, pi/2 for odd (sin -> cos)
    plane_ref     : (1, tS)    pre-scaled y or x coordinate plane tile (picked by g)
    out_ref       : (npf, tS)  output block for (batch b, half g, spatial tile s)
    tile_ref      : (npf, tS)  f32 VMEM scratch: embedding tile computed once per (g, s)
    """
    b = pl.program_id(2)

    @pl.when(b == 0)
    def _():
        # One sin per element, evaluated only for batch 0 of each (half, tile);
        # later batches just re-store the cached tile (pure store / DMA writeback).
        tile_ref[...] = jnp.sin(
            plane_ref[...] * inv_dim_t_ref[...] + phase_ref[...])

    out_ref[...] = tile_ref[...].astype(out_ref.dtype)


def _pick_spatial_block(hw, npf):
    """Largest lane-dense (multiple-of-128) spatial tile keeping one f32 output block
    around <= 8 MiB (VMEM-safe on v7x once double-buffered); full HW when it already
    fits (a block equal to the full array dim is always legal)."""
    budget = 8 << 20
    max_lanes = (budget // (npf * 4)) // 128 * 128
    max_lanes = int(min(max(max_lanes, 128), 32768))
    return hw if hw <= max_lanes else max_lanes


@functools.lru_cache(maxsize=None)
def _build_pos_embed(B, H, W, num_pos_feats, temperature, normalize, scale, out_dtype):
    """Builds (and caches) the (B, C, H, W) positional embedding; x-independent."""
    npf = num_pos_feats // 2          # matches self.num_pos_feats in the torch module
    C = 2 * npf
    HW = H * W

    # ---- trace-time constants (numpy: no runtime per-element int math) -------------
    k = np.arange(npf)
    dim_t = np.float64(temperature) ** (2.0 * (k // 2) / npf)
    inv_dim_t = (1.0 / dim_t).astype(np.float32).reshape(npf, 1)
    phase = ((k % 2) * (np.pi / 2.0)).astype(np.float32).reshape(npf, 1)

    rows = np.arange(1, H + 1, dtype=np.float64)   # 1-based, like torch.arange(1, H+1)
    cols = np.arange(1, W + 1, dtype=np.float64)
    if normalize:
        eps = 1e-6
        rows = rows / (H + eps) * scale            # y_embed[:, -1:, :] == H
        cols = cols / (W + eps) * scale            # x_embed[:, :, -1:] == W
    y_plane = np.broadcast_to(rows[:, None], (H, W)).reshape(HW)
    x_plane = np.broadcast_to(cols[None, :], (H, W)).reshape(HW)
    planes = np.stack([y_plane, x_plane]).astype(np.float32).reshape(2, 1, HW)

    # ---- lane-dense tiled pallas_call with batch folded into the grid ---------------
    tS = _pick_spatial_block(HW, npf)
    n_s = pl.cdiv(HW, tS)             # masked tail tile if HW is not a tS multiple
    grid = (2, n_s, B)                # (y/x half, spatial tile, batch) -- batch innermost

    out_block_bytes = npf * tS * 4
    vmem_limit = int(min(56 << 20, max(32 << 20, 4 * out_block_bytes + (4 << 20))))

    call = pl.pallas_call(
        _pos_embed_kernel,
        out_shape=jax.ShapeDtypeStruct((B, C, HW), out_dtype),
        grid=grid,
        in_specs=[
            pl.BlockSpec((npf, 1), lambda g, s, b: (0, 0)),           # inv_dim_t (tiny)
            pl.BlockSpec((npf, 1), lambda g, s, b: (0, 0)),           # phase     (tiny)
            pl.BlockSpec((None, 1, tS), lambda g, s, b: (g, 0, s)),   # y or x plane tile
        ],
        out_specs=pl.BlockSpec((None, npf, tS), lambda g, s, b: (b, g, s)),
        scratch_shapes=[pltpu.VMEM((npf, tS), jnp.float32)],
        compiler_params=pltpu.CompilerParams(
            # half & spatial axes parallel (keeps >= 2 programs for both v7x TCs);
            # batch must be "arbitrary" so the scratch tile computed at b == 0 is
            # always visible to the later batch stores on the same core.
            dimension_semantics=("parallel", "parallel", "arbitrary"),
            vmem_limit_bytes=vmem_limit,
        ),
    )

    @jax.jit
    def run(inv_dim_t_, phase_, planes_):
        pos = call(inv_dim_t_, phase_, planes_)          # (B, C, H*W), NCHW-contiguous
        return pos.reshape(B, C, H, W)                   # contiguous -> free bitcast

    return jax.block_until_ready(
        run(jnp.asarray(inv_dim_t), jnp.asarray(phase), jnp.asarray(planes)))


def position_embedding_sine(x, num_pos_feats=32, temperature=10000,
                            normalize=True, scale=None, out_dtype=jnp.float32):
    """Pallas equivalent of PositionEmbeddingSine(num_pos_feats).forward(x).

    Only x.shape is used (the embedding does not depend on x's values); results are
    memoized per (batch, H, W, config) exactly like the torch module's self.cache."""
    assert num_pos_feats % 2 == 0, "Expecting even model width"
    if scale is not None and not normalize:
        raise ValueError("normalize should be True if scale is passed")
    if scale is None:
        scale = 2 * math.pi
    B = int(x.shape[0])
    H, W = int(x.shape[-2]), int(x.shape[-1])
    return _build_pos_embed(B, H, W, int(num_pos_feats), float(temperature),
                            bool(normalize), float(scale), np.dtype(out_dtype))


def _reference(x, num_pos_feats=32, temperature=10000, normalize=True, scale=None):
    """Pure-JAX transcription of the PyTorch forward (for correctness check)."""
    if scale is None:
        scale = 2 * math.pi
    B, _, H, W = x.shape
    npf = num_pos_feats // 2
    y_embed = jnp.broadcast_to(
        jnp.arange(1, H + 1, dtype=jnp.float32)[None, :, None], (B, H, W))
    x_embed = jnp.broadcast_to(
        jnp.arange(1, W + 1, dtype=jnp.float32)[None, None, :], (B, H, W))
    if normalize:
        eps = 1e-6
        y_embed = y_embed / (y_embed[:, -1:, :] + eps) * scale
        x_embed = x_embed / (x_embed[:, :, -1:] + eps) * scale
    dim_t = jnp.arange(npf, dtype=jnp.float32)
    dim_t = temperature ** (2 * (dim_t // 2) / npf)
    pos_x = x_embed[..., None] / dim_t
    pos_y = y_embed[..., None] / dim_t
    pos_x = jnp.stack((jnp.sin(pos_x[..., 0::2]), jnp.cos(pos_x[..., 1::2])),
                      axis=4).reshape(B, H, W, -1)
    pos_y = jnp.stack((jnp.sin(pos_y[..., 0::2]), jnp.cos(pos_y[..., 1::2])),
                      axis=4).reshape(B, H, W, -1)
    pos = jnp.concatenate((pos_y, pos_x), axis=3).transpose(0, 3, 1, 2)
    return pos


if __name__ == "__main__":
    key = jax.random.PRNGKey(0)
    B, Cin, H, W = 2, 4, 16, 16
    num_pos_feats = 32  # output has 32 channels (2 * 16)

    x = jax.random.normal(key, (B, Cin, H, W), dtype=jnp.float32)

    pos = position_embedding_sine(x, num_pos_feats=num_pos_feats)
    pos = jax.block_until_ready(pos)

    ref = _reference(x, num_pos_feats=num_pos_feats)
    assert pos.shape == (B, num_pos_feats, H, W), pos.shape
    assert jnp.allclose(pos, ref, atol=1e-4, rtol=1e-4), \
        f"max err {jnp.max(jnp.abs(pos - ref))}"

    # Exercise the memoized (cache-hit) path: no device work on repeat calls.
    pos2 = position_embedding_sine(x, num_pos_feats=num_pos_feats)
    assert jnp.array_equal(pos2, pos)

    print("KERNEL_OK")
</pallas_src>

<mosaic_0001>
module attributes {stable_mosaic.version = 11 : i64} {
  func.func @_pos_embed_kernel(%arg0: i32, %arg1: i32, %arg2: i32, %arg3: memref<16x1xf32, #tpu.memory_space<vmem>>, %arg4: memref<16x1xf32, #tpu.memory_space<vmem>>, %arg5: memref<1x1x256xf32, #tpu.memory_space<vmem>>, %arg6: memref<1x16x256xf32, #tpu.memory_space<vmem>>, %arg7: memref<16x256xf32, #tpu.memory_space<vmem>>) attributes {dimension_semantics = [#tpu.dimension_semantics<parallel>, #tpu.dimension_semantics<parallel>, #tpu.dimension_semantics<arbitrary>], iteration_bounds = array<i64: 2, 1, 2>, scalar_prefetch = 0 : i64, scratch_operands = 1 : i64, tpu.core_type = #tpu.core_type<tc>, window_params = [{pipeline_mode = #tpu.pipeline_mode<synchronous>, transform_indices = @transform_0, window_bounds = array<i64: 16, 1>}, {pipeline_mode = #tpu.pipeline_mode<synchronous>, transform_indices = @transform_1, window_bounds = array<i64: 16, 1>}, {transform_indices = @transform_2, window_bounds = array<i64: 1, 1, 256>}, {transform_indices = @transform_3, window_bounds = array<i64: 1, 16, 256>}]} {
    %c0_i32 = arith.constant 0 : i32
    %0 = arith.cmpi eq, %arg2, %c0_i32 : i32
    %1 = arith.extui %0 : i1 to i32
    %c0_i32_0 = arith.constant 0 : i32
    %2 = arith.cmpi ne, %1, %c0_i32_0 : i32
    scf.if %2 {
      %c0_5 = arith.constant 0 : index
      %c0_6 = arith.constant 0 : index
      %c0_7 = arith.constant 0 : index
      %7 = vector.load %arg5[%c0_5, %c0_6, %c0_7] : memref<1x1x256xf32, #tpu.memory_space<vmem>>, vector<1x1x256xf32>
      %8 = vector.shape_cast %7 : vector<1x1x256xf32> to vector<1x256xf32>
      %c0_8 = arith.constant 0 : index
      %c0_9 = arith.constant 0 : index
      %9 = vector.load %arg3[%c0_8, %c0_9] : memref<16x1xf32, #tpu.memory_space<vmem>>, vector<16x1xf32>
      %10 = vector.broadcast %8 : vector<1x256xf32> to vector<16x256xf32>
      %11 = vector.broadcast %9 : vector<16x1xf32> to vector<16x256xf32>
      %12 = arith.mulf %10, %11 : vector<16x256xf32>
      %c0_10 = arith.constant 0 : index
      %c0_11 = arith.constant 0 : index
      %13 = vector.load %arg4[%c0_10, %c0_11] : memref<16x1xf32, #tpu.memory_space<vmem>>, vector<16x1xf32>
      %14 = vector.broadcast %13 : vector<16x1xf32> to vector<16x256xf32>
      %15 = arith.addf %12, %14 : vector<16x256xf32>
      %16 = math.sin %15 : vector<16x256xf32>
      %c0_12 = arith.constant 0 : index
      %c0_13 = arith.constant 0 : index
      %17 = vector.load %arg7[%c0_12, %c0_13] : memref<16x256xf32, #tpu.memory_space<vmem>>, vector<16x256xf32>
      tpu.vector_store %arg7[%c0_12, %c0_13], %16 {strides = array<i32>} : memref<16x256xf32, #tpu.memory_space<vmem>>, vector<16x256xf32>,
    } else {
    }
    %c0 = arith.constant 0 : index
    %c0_1 = arith.constant 0 : index
    %3 = vector.load %arg7[%c0, %c0_1] : memref<16x256xf32, #tpu.memory_space<vmem>>, vector<16x256xf32>
    %c0_2 = arith.constant 0 : index
    %c0_3 = arith.constant 0 : index
    %c0_4 = arith.constant 0 : index
    %4 = vector.load %arg6[%c0_2, %c0_3, %c0_4] : memref<1x16x256xf32, #tpu.memory_space<vmem>>, vector<1x16x256xf32>
    %5 = vector.shape_cast %4 : vector<1x16x256xf32> to vector<16x256xf32>
    %6 = vector.shape_cast %3 : vector<16x256xf32> to vector<1x16x256xf32>
    tpu.vector_store %arg6[%c0_2, %c0_3, %c0_4], %6 {strides = array<i32>} : memref<1x16x256xf32, #tpu.memory_space<vmem>>, vector<1x16x256xf32>,
    return
  }
  func.func @transform_0(%arg0: i32, %arg1: i32, %arg2: i32) -> (i32, i32) {
    %c0_i32 = arith.constant 0 : i32
    %c0_i32_0 = arith.constant 0 : i32
    %c0_i32_1 = arith.constant 0 : i32
    return %c0_i32, %c0_i32_0 : i32, i32
  }
  func.func @transform_1(%arg0: i32, %arg1: i32, %arg2: i32) -> (i32, i32) {
    %c0_i32 = arith.constant 0 : i32
    %c0_i32_0 = arith.constant 0 : i32
    %c0_i32_1 = arith.constant 0 : i32
    return %c0_i32, %c0_i32_0 : i32, i32
  }
  func.func @transform_2(%arg0: i32, %arg1: i32, %arg2: i32) -> (i32, i32, i32) {
    %c0_i32 = arith.constant 0 : i32
    %c0_i32_0 = arith.constant 0 : i32
    return %arg0, %c0_i32, %arg1 : i32, i32, i32
  }
  func.func @transform_3(%arg0: i32, %arg1: i32, %arg2: i32) -> (i32, i32, i32) {
    %c0_i32 = arith.constant 0 : i32
    return %arg2, %arg0, %arg1 : i32, i32, i32
  }
}

</mosaic_0001>

<bundles_post_ra>
// kernel: run.1
= control target key start
LH: loop header
LB: loop body
LE: loop exit
PB: predicated region body
PF: predicated region fallthrough
CT: control target
= control target key end

     0   :  { %s1151_s12 = smov 0   ;;  %s1153_s13 = smov 0   ;;  %s1659_s0 = inlined_call_operand.vmem [shape: f32[16,1], index: 0, kind: input, shape index: {}]   ;;  %s1660_s1 = inlined_call_operand.vmem [shape: f32[16,1], index: 1, kind: input, shape index: {}]   ;;  %s1661_s2 = inlined_call_operand.vmem [shape: f32[2,1,256], index: 2, kind: input, shape index: {}]   ;;  %s1662_s3 = inlined_call_operand.vmem [shape: f32[2,32,256], index: 3, kind: output, shape index: {}]  }
   0x1   :  { %s1155_s14 = smov 0   ;;  %s1157_s15 = smov 0  }
   0x2   :  { %s1159_s16 = smov 0  }
   0x3 LB: > { %s25_s17 = sadd.s32 1, %s1114_s14  ;;  %s32_s18 = sadd.s32 1, %s1118_s15  ;;  %s1122_s16 = sphi %s1159_s16, %s13_s16   ;;  %s1118_s15 = sphi %s1157_s15, %s1672_s15   ;;  %s1114_s14 = sphi %s1155_s14, %s1671_s14   ;;  %s1110_s13 = sphi %s1153_s13, %s1670_s13   ;;  %s1106_s12 = sphi %s1151_s12, %s1669_s12  }
   0x4   : > { %p26_p0 = scmp.ge.s32.totalorder %s25_s17, 2  ;;  %p1014_p1 = scmp.ge.s32.totalorder %s1122_s16, 1 }
   0x5   : > { %p166_p2 = scmp.lt.s32.totalorder %s1122_s16, 5 }
   0x6   : > { %s1674_s17 = smov (%p26_p0, %s25_s17), 0  ;;  %s1676_s18 = smov (!%p26_p0, %s32_s18), %s1118_s15 }
   0x7   : > { %p167_p3 = pnand %p1014_p1, %p166_p2  ;;  %p34_p4 = scmp.ge.s32.totalorder %s1676_s18, 2 }
   0x8   : > { %p203_p5 = scmp.lt.s32.totalorder (!%p167_p3), %s1110_s13, 1  ;;  %s1016_s19 = sshll.u32 (!%p167_p3), %s1110_s13, 1 }
   0x9   : > { %s1678_s18 = smov (%p34_p4, %s1676_s18), 0  ;;  %170 = sbr.rel (%p167_p3) target bundleno = 345 (0x159), region = 32 }
   0xa   : > { %p213_p6 = scmp.lt.s32.totalorder (!%p167_p3), %s1106_s12, 1  ;;  %p215_p7 = scmp.lt.s32.totalorder (!%p167_p3), %s1016_s19, 3 }
   0xb   : > { %p1020_p8 = scmp.ne.s32.totalorder (!%p167_p3), %s1106_s12, 0 }
   0xe   : > { %s1680_s13 = smov (!%p203_p5, %s1110_s13), 1  ;;  %s1682_s19 = smov (!%p215_p7, %s1016_s19), 3 }
   0xf   : > { %s214_s20 = scalar_select %p213_p6, %s1106_s12, 1 }
  0x10   : > { %s1015_s21 = sshll.u32 %s1680_s13, 1  ;;  %s1017_s26 = sshll.u32 %s1682_s19, 1 }
  0x11   : > { %s209_s24 = scalar_lea.vmem %s1661_s2, %s1015_s21  ;;  %s1018_s25 = sshll.u32 %s214_s20, 3 }
  0x12   : > { %s222_s27 = sadd.s32 %s1018_s25, %s1017_s26  ;;  %230 = sbr.rel (%p1020_p8) target bundleno = 337 (0x151), region = 36 }
  0x13   : > { %s1019_s28 = sshll.u32 %s222_s27, 3 }
  0x14   : > { %s1191_s4 = scalar_lea.vmem %s1662_s3, %s1019_s28 }
  0x17   : > { %v253_v0 = vld [vmem:[%s1660_s1] sm:$0xff]  ;;  %v1124_v2 = vmov 0   ;;  %v254_v3 = vld [vmem:[%s1660_s1 + $0x8] sm:$0xff]  ;;  %v1125_v42 = vmov 683565275  }
  0x18   : > { %v232_v1 = vld [vmem:[%s1659_s0] sm:$0xff]  ;;  %1083 = vset.pattern.permute.xlu1 %v1124_v2  ;;  %1082 = vset.pattern.permute.xlu0 %v1124_v2  ;;  %v233_v4 = vld [vmem:[%s1659_s0 + $0x8] sm:$0xff]  ;;  %v1126_v44 = vmov 2475754826   ;;  %v1127_v48 = vmov 2131351028  }
  0x19   : > { %257 = vperm.xlu1 %1083, %v253_v0   ;;  %241 = vperm.xlu0 %1082, %v232_v1   ;;  %v1208_v5 = vld [vmem:[%s209_s24] sm:$0x3]  ;;  %v1128_v51 = vmov 2102212464   ;;  %v1129_v54 = vmov 920167782  }
  0x1a   : > { %v235_v6 = vperm.slane %v1208_v5, 0  ;;  %v236_v7 = vperm.slane %v1208_v5, 1  ;;  %v1130_v57 = vmov 1326507024  }
  0x21   : > { %262 = vperm.xlu1 %1083, %v254_v3   ;;  %246 = vperm.xlu0 %1082, %v233_v4  }
  0x8b   : > { %v242_v8 = vpop.permute.xlu0 %241  ;;  %v258_v11 = vpop.permute.xlu1 %257 }
  0x8c   : > { %v249_v9 = vmul.f32 %v242_v8, %v235_v6  ;;  %v250_v10 = vmul.f32 %v242_v8, %v236_v7 }
  0x8e   : > { %v1214_v12 = vadd.f32 %v258_v11, %v249_v9  ;;  %v1216_v13 = vadd.f32 %v258_v11, %v250_v10 }
  0x90   : > { %v269_v14 = vand.u32 2147483647, %v1214_v12  ;;  %v272_v15 = vand.u32 2139095040, %v1214_v12  ;;  %v424_v16 = vand.u32 2147483647, %v1216_v13  ;;  %v427_v17 = vand.u32 2139095040, %v1216_v13 }
  0x92   : > { %v273_v18 = vshrl.u32 %v272_v15, 23  ;;  %v276_v19 = vand.u32 8388607, %v269_v14  ;;  %v428_v20 = vshrl.u32 %v427_v17, 23  ;;  %v431_v21 = vand.u32 8388607, %v424_v16 }
  0x93   : > { %v1226_v24 = vpop.permute.xlu0 %246  ;;  %v1233_v35 = vpop.permute.xlu1 %262 }
  0x94   : > { %v1021_v22 = vadd.s32 4294967169, %v273_v18  ;;  %v277_v23 = vor.u32 8388608, %v276_v19  ;;  %v1024_v25 = vadd.s32 4294967169, %v428_v20  ;;  %v432_v26 = vor.u32 8388608, %v431_v21 }
  0x95   : > { %v251_v29 = vmul.f32 %v1226_v24, %v235_v6 }
  0x96   : > { %v279_v27 = vadd.s32 1, %v1021_v22  ;;  %v434_v28 = vadd.s32 1, %v1024_v25  ;;  %v1229_v30 = vshll.u32 %v277_v23, 8  ;;  %v1231_v32 = vshll.u32 %v432_v26, 8 }
  0x97   : > { %v1236_v36 = vadd.f32 %v1233_v35, %v251_v29 }
  0x98   : > { %vm280_vm0 = vcmp.gt.s32.totalorder %v279_v27, 0  ;;  %vm435_vm1 = vcmp.gt.s32.totalorder %v434_v28, 0  ;;  %v1239_v38 = vand.u32 65535, %v1229_v30  ;;  %v1242_v39 = vshrl.u32 %v1229_v30, 16 }
  0x99   : > { %v281_v31 = vsel %vm280_vm0, %v279_v27, 0  ;;  %v436_v34 = vsel %vm435_vm1, %v434_v28, 0  ;;  %v1251_v46 = vand.u32 65535, %v1231_v32  ;;  %vm271_vm1 = vcmp.lt.s32.totalorder %v1214_v12, 0 }
  0x9a   : > { %v283_v33 = vand.u32 31, %v281_v31  ;;  %v1244_v40 = vand.u32 31, %v436_v34  ;;  %v1246_v41 = vshrl.u32 %v281_v31, 5  ;;  %v1293_v29 = vshrl.u32 %v436_v34, 5 }
  0x9c   : > { %v284_v37 = vsub.s32 32, %v283_v33  ;;  %v286_v43 = vshll.u32 %v1125_v42, %v283_v33  ;;  %v289_v45 = vshll.u32 %v1126_v44, %v283_v33  ;;  %v292_v50 = vshll.u32 %v1127_v48, %v283_v33 }
  0x9d   : > { %v295_v53 = vshll.u32 %v1128_v51, %v283_v33  ;;  %v298_v56 = vshll.u32 %v1129_v54, %v283_v33  ;;  %v1262_v62 = vsub.s32 32, %v1244_v40  ;;  %vm301_vm2 = vcmp.lt.s32.totalorder %v1246_v41, 1 }
  0x9e   : > { %v287_v47 = vshrl.u32 %v1126_v44, %v284_v37  ;;  %v290_v49 = vshrl.u32 %v1127_v48, %v284_v37  ;;  %v293_v52 = vshrl.u32 %v1128_v51, %v284_v37  ;;  %v296_v55 = vshrl.u32 %v1129_v54, %v284_v37 }
  0x9f   : > { %v299_v58 = vshrl.u32 %v1130_v57, %v284_v37  ;;  %vm302_vm3 = vcmp.lt.s32.totalorder %v1246_v41, 2  ;;  %v285_v1 = vshrl.u32 %v1125_v42, %v284_v37  ;;  %vm304_vm4 = vcmp.lt.s32.totalorder %v1246_v41, 4 }
  0xa0   : > { %v288_v59 = vor.u32 %v287_v47, %v286_v43  ;;  %v291_v60 = vor.u32 %v290_v49, %v289_v45  ;;  %v294_v61 = vor.u32 %v293_v52, %v292_v50  ;;  %v297_v63 = vor.u32 %v296_v55, %v295_v53 }
  0xa1   : > { %v300_v0 = vor.u32 %v299_v58, %v298_v56  ;;  %vm303_vm5 = vcmp.lt.s32.totalorder %v1246_v41, 3  ;;  %v441_v9 = vshll.u32 %v1125_v42, %v1244_v40  ;;  %v442_v17 = vshrl.u32 %v1126_v44, %v1262_v62 }
  0xa2   : > { %v309_v3 = vsel %vm301_vm2, %v288_v59, %v291_v60  ;;  %v313_v4 = vsel %vm301_vm2, %v291_v60, %v294_v61  ;;  %v310_v6 = vsel %vm304_vm4, %v297_v63, 920167782  ;;  %v306_v10 = vsel %vm304_vm4, %v294_v61, 2102212464 }
  0xa3   : > { %v314_v8 = vsel %vm304_vm4, %v300_v0, 1326507024  ;;  %v311_v11 = vsel %vm303_vm5, %v294_v61, %v310_v6  ;;  %v444_v20 = vshll.u32 %v1126_v44, %v1244_v40  ;;  %v445_v21 = vshrl.u32 %v1127_v48, %v1262_v62 }
  0xa4   : > { %v315_v15 = vsel %vm303_vm5, %v297_v63, %v314_v8  ;;  %v312_v18 = vsel %vm302_vm3, %v309_v3, %v311_v11  ;;  %v305_v27 = vsel %vm301_vm2, %v285_v1, %v288_v59  ;;  %v307_v28 = vsel %vm303_vm5, %v291_v60, %v306_v10 }
  0xa5   : > { %v316_v19 = vsel %vm302_vm3, %v313_v4, %v315_v15  ;;  %v342_v25 = vand.u32 65535, %v312_v18  ;;  %v343_v26 = vshrl.u32 %v312_v18, 16  ;;  %v1295_v31 = vor.u32 %v442_v17, %v441_v9 }
  0xa6   : > { %v320_v22 = vand.u32 65535, %v316_v19  ;;  %v321_v23 = vshrl.u32 %v316_v19, 16  ;;  %v1299_v43 = vor.u32 %v445_v21, %v444_v20  ;;  %v448_v45 = vshrl.u32 %v1128_v51, %v1262_v62 }
  0xa7   : > { %v345_v49 = vmul.u32 %v343_v26, %v1239_v38  ;;  %v346_v50 = vmul.u32 %v342_v25, %v1242_v39  ;;  %v447_v34 = vshll.u32 %v1127_v48, %v1244_v40  ;;  %v344_v55 = vmul.u32 %v342_v25, %v1239_v38 }
  0xa8   : > { %v323_v33 = vmul.u32 %v321_v23, %v1239_v38  ;;  %v324_v37 = vmul.u32 %v320_v22, %v1242_v39  ;;  %v322_v47 = vmul.u32 %v320_v22, %v1239_v38  ;;  %v325_v52 = vmul.u32 %v321_v23, %v1242_v39 }
  0xa9   : > { %v347_v56 = vmul.u32 %v343_v26, %v1242_v39  ;;  %v348_v61 = vshll.u32 %v345_v49, 16  ;;  %v350_v0 = vshll.u32 %v346_v50, 16  ;;  %v449_v1 = vor.u32 %v448_v45, %v447_v34 }
  0xaa   : > { %v326_v53 = vshll.u32 %v323_v33, 16  ;;  %v327_v58 = vshrl.u32 %v323_v33, 16  ;;  %v328_v59 = vshll.u32 %v324_v37, 16  ;;  %v329_v60 = vshrl.u32 %v324_v37, 16 }
  0xab   : > { %vm352_vm7 = vc.u32 %v344_v55, %v348_v61  ;;  %v354_v4 = vadd.s32 %v348_v61, %v344_v55  ;;  %v451_v6 = vshrl.u32 %v1129_v54, %v1262_v62  ;;  %v450_v39 = vshll.u32 %v1128_v51, %v1244_v40 }
  0xac   : > { %vm330_vm6 = vc.u32 %v322_v47, %v326_v53  ;;  %v332_v63 = vadd.s32 %v326_v53, %v322_v47  ;;  %v353_v38 = vsel %vm352_vm7, 1, %v1124_v2  ;;  %v453_v11 = vshll.u32 %v1129_v54, %v1244_v40 }
  0xad   : > { %v331_v3 = vsel %vm330_vm6, 1, %v1124_v2  ;;  %v355_v10 = vadd.s32 %v353_v38, %v347_v56  ;;  %vm356_vm9 = vc.u32 %v354_v4, %v350_v0  ;;  %v452_v18 = vor.u32 %v451_v6, %v450_v39 }
  0xae   : > { %v333_v8 = vadd.s32 %v331_v3, %v325_v52  ;;  %vm334_vm8 = vc.u32 %v332_v63, %v328_v59  ;;  %v357_v17 = vsel %vm356_vm9, 1, %v1124_v2  ;;  %v454_v19 = vshrl.u32 %v1130_v57, %v1262_v62 }
  0xaf   : > { %v335_v9 = vsel %vm334_vm8, 1, %v1124_v2  ;;  %v349_v20 = vshrl.u32 %v345_v49, 16  ;;  %v351_v21 = vshrl.u32 %v346_v50, 16  ;;  %v1323_v22 = vadd.s32 %v354_v4, %v350_v0 }
  0xb0   : > { %v337_v15 = vadd.s32 %v335_v9, %v333_v8  ;;  %v359_v23 = vadd.s32 %v357_v17, %v355_v10  ;;  %v455_v26 = vor.u32 %v454_v19, %v453_v11  ;;  %vm456_vm10 = vcmp.lt.s32.totalorder %v1293_v29, 1 }
  0xb1   : > { %vm459_vm11 = vcmp.lt.s32.totalorder %v1293_v29, 4  ;;  %vm458_vm12 = vcmp.lt.s32.totalorder %v1293_v29, 3  ;;  %v464_v40 = vsel %vm456_vm10, %v1295_v31, %v1299_v43  ;;  %vm457_vm13 = vcmp.lt.s32.totalorder %v1293_v29, 2 }
  0xb2   : > { %v338_v25 = vadd.s32 %v337_v15, %v327_v58  ;;  %v360_v33 = vadd.s32 %v359_v23, %v349_v20  ;;  %v465_v37 = vsel %vm459_vm11, %v452_v18, 920167782  ;;  %v468_v49 = vsel %vm456_vm10, %v1299_v43, %v449_v1 }
  0xb3   : > { %v466_v47 = vsel %vm458_vm12, %v449_v1, %v465_v37  ;;  %v308_v50 = vsel %vm302_vm3, %v305_v27, %v307_v28  ;;  %v469_v53 = vsel %vm459_vm11, %v455_v26, 1326507024  ;;  %v474_v56 = vshrl.u32 %v1231_v32, 16 }
  0xb4   : > { %v1334_v45 = vadd.s32 %v338_v25, %v329_v60  ;;  %v361_v34 = vadd.s32 %v360_v33, %v351_v21  ;;  %v467_v52 = vsel %vm457_vm13, %v464_v40, %v466_v47  ;;  %v470_v55 = vsel %vm458_vm12, %v452_v18, %v469_v53 }
  0xb5   : > { %v497_v58 = vand.u32 65535, %v467_v52  ;;  %v471_v41 = vsel %vm457_vm13, %v468_v49, %v470_v55  ;;  %v498_v27 = vshrl.u32 %v467_v52, 16  ;;  %v582_v28 = vand.u32 2139095040, %v1236_v36 }
  0xb6   : > { %vm364_vm14 = vc.u32 %v1334_v45, %v1323_v22  ;;  %v365_v59 = vadd.s32 1, %v361_v34  ;;  %v362_v60 = vmul.u32 %v1229_v30, %v308_v50  ;;  %v475_v61 = vand.u32 65535, %v471_v41 }
  0xb7   : > { %v476_v63 = vshrl.u32 %v471_v41, 16  ;;  %v440_v3 = vshrl.u32 %v1125_v42, %v1262_v62  ;;  %v500_v4 = vmul.u32 %v498_v27, %v1251_v46  ;;  %v501_v6 = vmul.u32 %v497_v58, %v474_v56 }
  0xb8   : > { %v366_v0 = vsel %vm364_vm14, %v365_v59, %v361_v34  ;;  %v461_v38 = vsel %vm459_vm11, %v449_v1, 2102212464  ;;  %v479_v9 = vmul.u32 %v475_v61, %v474_v56  ;;  %v499_v10 = vmul.u32 %v497_v58, %v1251_v46 }
  0xb9   : > { %v367_v8 = vadd.s32 %v366_v0, %v362_v60  ;;  %v478_v39 = vmul.u32 %v476_v63, %v1251_v46  ;;  %v502_v11 = vmul.u32 %v498_v27, %v474_v56  ;;  %v503_v30 = vshll.u32 %v500_v4, 16 }
  0xba   : > { %v583_v15 = vshrl.u32 %v582_v28, 23  ;;  %v477_v18 = vmul.u32 %v475_v61, %v1251_v46  ;;  %v480_v19 = vmul.u32 %v476_v63, %v474_v56  ;;  %v483_v20 = vshll.u32 %v479_v9, 16 }
  0xbb   : > { %v368_v17 = vadd.s32 536870912, %v367_v8  ;;  %v481_v62 = vshll.u32 %v478_v39, 16  ;;  %v505_v21 = vshll.u32 %v501_v6, 16  ;;  %vm507_vm15 = vc.u32 %v499_v10, %v503_v30 }
  0xbc   : > { %v509_v23 = vadd.s32 %v503_v30, %v499_v10  ;;  %v508_v26 = vsel %vm507_vm15, 1, %v1124_v2  ;;  %v460_v46 = vsel %vm456_vm10, %v440_v3, %v1295_v31  ;;  %v462_v49 = vsel %vm458_vm12, %v1299_v43, %v461_v38 }
  0xbd   : > { %v369_v25 = vshrl.u32 %v368_v17, 30  ;;  %vm485_vm0 = vc.u32 %v477_v18, %v481_v62  ;;  %v487_v1 = vadd.s32 %v481_v62, %v477_v18  ;;  %v510_v40 = vadd.s32 %v508_v26, %v502_v11 }
  0xbe   : > { %v486_v33 = vsel %vm485_vm0, 1, %v1124_v2  ;;  %vm511_vm2 = vc.u32 %v509_v23, %v505_v21  ;;  %v1027_v52 = vadd.s32 4294967169, %v583_v15  ;;  %v482_v55 = vshrl.u32 %v478_v39, 16 }
  0xbf   : > { %v370_v37 = vshll.u32 %v369_v25, 30  ;;  %v488_v47 = vadd.s32 %v486_v33, %v480_v19  ;;  %vm489_vm3 = vc.u32 %v487_v1, %v483_v20  ;;  %v512_v34 = vsel %vm511_vm2, 1, %v1124_v2 }
  0xc0   : > { %v490_v50 = vsel %vm489_vm3, 1, %v1124_v2  ;;  %v514_v58 = vadd.s32 %v512_v34, %v510_v40  ;;  %v393_v59 = vsub.s32 4, %v369_v25  ;;  %v504_v41 = vshrl.u32 %v500_v4, 16 }
  0xc1   : > { %v371_v53 = vsub.s32 %v367_v8, %v370_v37  ;;  %v492_v56 = vadd.s32 %v490_v50, %v488_v47  ;;  %v579_v27 = vand.u32 2147483647, %v1236_v36  ;;  %v589_v31 = vadd.s32 1, %v1027_v52 }
  0xc2   : > { %v484_v60 = vshrl.u32 %v479_v9, 16  ;;  %v463_v43 = vsel %vm457_vm13, %v460_v46, %v462_v49  ;;  %v506_v63 = vshrl.u32 %v501_v6, 16  ;;  %v515_v0 = vadd.s32 %v514_v58, %v504_v41 }
  0xc3   : > { %vm372_vm4 = vcmp.lt.s32.totalorder %v371_v53, 0  ;;  %v373_v28 = vsub.s32 0, %v371_v53  ;;  %v493_v61 = vadd.s32 %v492_v56, %v482_v55  ;;  %vm590_vm5 = vcmp.gt.s32.totalorder %v589_v31, 0 }
  0xc4   : > { %v1381_v38 = vadd.s32 %v509_v23, %v505_v21  ;;  %v591_v39 = vsel %vm590_vm5, %v589_v31, 0  ;;  %v394_v10 = vsel %vm271_vm1, %v393_v59, %v369_v25  ;;  %v516_v11 = vadd.s32 %v515_v0, %v506_v63 }
  0xc5   : > { %v374_v3 = vsel %vm372_vm4, %v373_v28, %v371_v53  ;;  %v1379_v8 = vadd.s32 %v493_v61, %v484_v60  ;;  %v593_v30 = vand.u32 31, %v591_v39  ;;  %vm1387_vm6 = vcmp.le.f32.partialorder %v269_v14, 0.7853982 }
  0xc6   : > { %v375_v4 = vclz %v374_v3  ;;  %v520_v9 = vadd.s32 1, %v516_v11  ;;  %v363_v17 = vadd.s32 %v1323_v22, %v1334_v45  ;;  %v396_v18 = vsel %vm1387_vm6, 0, %v394_v10 }
  0xc7   : > { %vm519_vm7 = vc.u32 %v1379_v8, %v1381_v38  ;;  %v594_v15 = vsub.s32 32, %v593_v30  ;;  %v517_v19 = vmul.u32 %v1231_v32, %v463_v43  ;;  %v586_v14 = vand.u32 8388607, %v579_v27 }
  0xc8   : > { %v1022_v6 = vadd.s32 4294967294, %v375_v4  ;;  %v521_v62 = vsel %vm519_vm7, %v520_v9, %v516_v11  ;;  %v1400_v20 = vshrl.u32 %v591_v39, 5  ;;  %v596_v21 = vshll.u32 %v1125_v42, %v593_v30 }
  0xc9   : > { %v522_v25 = vadd.s32 %v521_v62, %v517_v19  ;;  %v597_v1 = vshrl.u32 %v1126_v44, %v594_v15  ;;  %v600_v22 = vshrl.u32 %v1127_v48, %v594_v15  ;;  %v599_v33 = vshll.u32 %v1126_v44, %v593_v30 }
  0xca   : > { %vm1023_vm8 = vcmp.lt.s32.totalorder %v1022_v6, 0  ;;  %v603_v32 = vshrl.u32 %v1128_v51, %v594_v15  ;;  %v602_v37 = vshll.u32 %v1127_v48, %v593_v30  ;;  %v605_v46 = vshll.u32 %v1128_v51, %v593_v30 }
  0xcb   : > { %v378_v23 = vsel %vm1023_vm8, 0, %v1022_v6  ;;  %v523_v40 = vadd.s32 536870912, %v522_v25  ;;  %v606_v47 = vshrl.u32 %v1129_v54, %v594_v15  ;;  %v609_v52 = vshrl.u32 %v1130_v57, %v594_v15 }
  0xcc   : > { %v379_v45 = vsub.s32 32, %v378_v23  ;;  %v383_v26 = vsub.s32 4294967266, %v378_v23  ;;  %v380_v49 = vshll.u32 %v371_v53, %v378_v23  ;;  %v598_v56 = vor.u32 %v597_v1, %v596_v21 }
  0xcd   : > { %v1411_v55 = vshrl.u32 %v523_v40, 30  ;;  %v1413_v58 = vor.u32 %v600_v22, %v599_v33  ;;  %v607_v59 = vor.u32 %v606_v47, %v605_v46  ;;  %v604_v28 = vor.u32 %v603_v32, %v602_v37 }
  0xce   : > { %v381_v50 = vshrl.u32 %v363_v17, %v379_v45  ;;  %v384_v34 = vadd.s32 127, %v383_v26  ;;  %v608_v60 = vshll.u32 %v1129_v54, %v593_v30  ;;  %v413_v61 = vadd.s32 3, %v396_v18 }
  0xcf   : > { %v525_v43 = vshll.u32 %v1411_v55, 30  ;;  %v252_v53 = vmul.f32 %v1226_v24, %v236_v7  ;;  %v587_v63 = vor.u32 8388608, %v586_v14  ;;  %vm611_vm9 = vcmp.lt.s32.totalorder %v1400_v20, 1 }
  0xd0   : > { %v382_v41 = vor.u32 %v381_v50, %v380_v49  ;;  %v385_v31 = vshll.u32 %v384_v34, 23  ;;  %v610_v3 = vor.u32 %v609_v52, %v608_v60  ;;  %vm614_vm10 = vcmp.lt.s32.totalorder %v1400_v20, 4 }
  0xd1   : > { %v1422_v39 = vsub.s32 %v522_v25, %v525_v43  ;;  %vm613_vm11 = vcmp.lt.s32.totalorder %v1400_v20, 3  ;;  %v619_v4 = vsel %vm611_vm9, %v598_v56, %v1413_v58  ;;  %v620_v5 = vsel %vm614_vm10, %v607_v59, 920167782 }
  0xd2   : > { %v386_v0 = vor.u32 4788187, %v385_v31  ;;  %v389_v7 = vcvt.s32.f32 %v382_v41  ;;  %v621_v24 = vsel %vm613_vm11, %v604_v28, %v620_v5  ;;  %vm612_vm13 = vcmp.lt.s32.totalorder %v1400_v20, 2 }
  0xd3   : > { %vm527_vm12 = vcmp.lt.s32.totalorder %v1422_v39, 0  ;;  %v528_v11 = vsub.s32 0, %v1422_v39  ;;  %v1435_v30 = vshll.u32 %v587_v63, 8  ;;  %v1439_v9 = vsel %vm612_vm13, %v619_v4, %v621_v24 }
  0xd4   : > { %v387_v10 = vand.u32 2147483647, %v386_v0  ;;  %v623_v17 = vsel %vm611_vm9, %v1413_v58, %v604_v28  ;;  %v624_v18 = vsel %vm614_vm10, %v610_v3, 1326507024  ;;  %v1446_v19 = vand.u32 3, %v413_v61 }
  0xd5   : > { %v529_v14 = vsel %vm527_vm12, %v528_v11, %v1422_v39  ;;  %v1450_v62 = vadd.f32 %v1233_v35, %v252_v53  ;;  %v625_v21 = vsel %vm613_vm11, %v607_v59, %v624_v18  ;;  %v595_v1 = vshrl.u32 %v1125_v42, %v594_v15 }
  0xd6   : > { %v390_v6 = vmul.f32 %v389_v7, %v387_v10  ;;  %v530_v25 = vclz %v529_v14  ;;  %v626_v22 = vsel %vm612_vm13, %v623_v17, %v625_v21  ;;  %v628_v45 = vand.u32 65535, %v1435_v30 }
  0xd7   : > { %v629_v26 = vshrl.u32 %v1435_v30, 16  ;;  %v630_v33 = vand.u32 65535, %v626_v22  ;;  %v652_v32 = vand.u32 65535, %v1439_v9  ;;  %v631_v37 = vshrl.u32 %v626_v22, 16 }
  0xd8   : > { %v391_v23 = vxor.u32 2147483648, %v390_v6  ;;  %v1025_v40 = vadd.s32 4294967294, %v530_v25  ;;  %v653_v46 = vshrl.u32 %v1439_v9, 16  ;;  %v518_v47 = vadd.s32 %v1381_v38, %v1379_v8 }
  0xd9   : > { %v548_v49 = vsub.s32 4, %v1411_v55  ;;  %v1471_v50 = vmul.u32 %v630_v33, %v629_v26  ;;  %v1477_v52 = vsel %vm611_vm9, %v595_v1, %v598_v56  ;;  %v633_v59 = vmul.u32 %v631_v37, %v628_v45 }
  0xda   : > { %v392_v35 = vsel %vm271_vm1, %v391_v23, %v390_v6  ;;  %vm1026_vm14 = vcmp.lt.s32.totalorder %v1025_v40, 0  ;;  %v616_v29 = vsel %vm614_vm10, %v604_v28, 2102212464  ;;  %v632_v31 = vmul.u32 %v630_v33, %v628_v45 }
  0xdb   : > { %v1466_v15 = vsel %vm1387_vm6, %v1214_v12, %v392_v35  ;;  %v533_v41 = vsel %vm1026_vm14, 0, %v1025_v40  ;;  %v654_v60 = vmul.u32 %v652_v32, %v628_v45  ;;  %v655_v43 = vmul.u32 %v653_v46, %v628_v45 }
  0xdc   : > { %v397_v34 = vmul.f32 %v1466_v15, %v1466_v15  ;;  %v534_v61 = vsub.s32 32, %v533_v41  ;;  %v538_v53 = vsub.s32 4294967266, %v533_v41  ;;  %v635_v63 = vmul.u32 %v631_v37, %v629_v26 }
  0xdd   : > { %v636_v0 = vshll.u32 %v633_v59, 16  ;;  %v638_v3 = vshll.u32 %v1471_v50, 16  ;;  %v535_v56 = vshll.u32 %v1422_v39, %v533_v41  ;;  %v656_v28 = vmul.u32 %v652_v32, %v629_v26 }
  0xde   : > { %v398_v8 = vmul.f32 -0.001358992, %v397_v34  ;;  %v405_v38 = vmul.f32 -0.00019511016, %v397_v34  ;;  %v536_v10 = vshrl.u32 %v518_v47, %v534_v61  ;;  %v539_v7 = vadd.s32 127, %v538_v53 }
  0xdf   : > { %vm640_vm15 = vc.u32 %v632_v31, %v636_v0  ;;  %v642_v24 = vadd.s32 %v636_v0, %v632_v31  ;;  %vm426_vm0 = vcmp.lt.s32.totalorder %v1216_v13, 0  ;;  %v658_v17 = vshll.u32 %v655_v43, 16 }
  0xe0   : > { %v399_v4 = vadd.f32 0.041655596, %v398_v8  ;;  %v406_v5 = vadd.f32 0.008332121, %v405_v38  ;;  %v641_v9 = vsel %vm640_vm15, 1, %v1124_v2  ;;  %v537_v18 = vor.u32 %v536_v10, %v535_v56 }
  0xe1   : > { %v540_v14 = vshll.u32 %v539_v7, 23  ;;  %v643_v21 = vadd.s32 %v641_v9, %v635_v63  ;;  %vm644_vm1 = vc.u32 %v642_v24, %v638_v3  ;;  %v637_v1 = vshrl.u32 %v633_v59, 16 }
  0xe2   : > { %v400_v11 = vmul.f32 %v399_v4, %v397_v34  ;;  %v407_v6 = vmul.f32 %v406_v5, %v397_v34  ;;  %v645_v39 = vsel %vm644_vm1, 1, %v1124_v2  ;;  %vm416_vm2 = vcmp.eq.s32.totalorder %v1446_v19, 0 }
  0xe3   : > { %vm1489_vm3 = vcmp.le.f32.partialorder %v424_v16, 0.7853982  ;;  %v541_v45 = vor.u32 4788187, %v540_v14  ;;  %v647_v33 = vadd.s32 %v645_v39, %v643_v21  ;;  %v657_v32 = vmul.u32 %v653_v46, %v629_v26 }
  0xe4   : > { %v401_v23 = vadd.f32 -0.4999988, %v400_v11  ;;  %v408_v25 = vadd.f32 -0.16666654, %v407_v6  ;;  %v660_v35 = vshll.u32 %v656_v28, 16  ;;  %vm415_vm4 = vcmp.lt.s32.totalorder %v1446_v19, 2 }
  0xe5   : > { %vm662_vm5 = vc.u32 %v654_v60, %v658_v17  ;;  %v664_v47 = vadd.s32 %v658_v17, %v654_v60  ;;  %vm412_vm6 = vweird.f32 %v1214_v12  ;;  %v542_v59 = vand.u32 2147483647, %v541_v45 }
  0xe6   : > { %v402_v40 = vmul.f32 %v401_v23, %v397_v34  ;;  %v409_v37 = vmul.f32 %v408_v25, %v397_v34  ;;  %v544_v41 = vcvt.s32.f32 %v537_v18  ;;  %v648_v31 = vadd.s32 %v647_v33, %v637_v1 }
  0xe7   : > { %v663_v16 = vsel %vm662_vm5, 1, %v1124_v2  ;;  %vm666_vm7 = vc.u32 %v664_v47, %v660_v35  ;;  %v617_v26 = vsel %vm613_vm11, %v1413_v58, %v616_v29  ;;  %v639_v46 = vshrl.u32 %v1471_v50, 16 }
  0xe8   : > { %v403_v8 = vadd.f32 1.0, %v402_v40  ;;  %v410_v38 = vadd.f32 1.0, %v409_v37  ;;  %v665_v61 = vadd.s32 %v663_v16, %v657_v32  ;;  %v545_v53 = vmul.f32 %v544_v41, %v542_v59 }
  0xe9   : > { %v667_v34 = vsel %vm666_vm7, 1, %v1124_v2  ;;  %v659_v0 = vshrl.u32 %v655_v43, 16  ;;  %vm419_vm8 = vcmp.eq.s32.totalorder %v1446_v19, 2  ;;  %v549_v5 = vsel %vm426_vm0, %v548_v49, %v1411_v55 }
  0xea   : > { %v411_v60 = vmul.f32 %v410_v38, %v1466_v15  ;;  %v420_v63 = vxor.u32 2147483648, %v403_v8  ;;  %v669_v3 = vadd.s32 %v667_v34, %v665_v61  ;;  %v546_v4 = vxor.u32 2147483648, %v545_v53 }
  0xeb   : > { %v1508_v56 = vadd.s32 %v648_v31, %v639_v46  ;;  %v661_v50 = vshrl.u32 %v656_v28, 16  ;;  %v737_v10 = vand.u32 2139095040, %v1450_v62  ;;  %v618_v7 = vsel %vm612_vm13, %v1477_v52, %v617_v26 }
  0xec   : > { %v417_v58 = vxor.u32 2147483648, %v411_v60  ;;  %v670_v29 = vadd.s32 %v669_v3, %v659_v0  ;;  %v421_v15 = vsel %vm419_vm8, %v420_v63, %v411_v60  ;;  %v547_v43 = vsel %vm426_vm0, %v546_v4, %v545_v53 }
  0xed   : > { %v1516_v24 = vadd.s32 %v664_v47, %v660_v35  ;;  %v550_v49 = vsel %vm1489_vm3, %v1216_v13, %v547_v43  ;;  %v738_v11 = vshrl.u32 %v737_v10, 23  ;;  %v551_v9 = vsel %vm1489_vm3, 0, %v549_v5 }
  0xee   : > { %v418_v55 = vsel %vm416_vm2, %v403_v8, %v417_v58  ;;  %v671_v28 = vadd.s32 %v670_v29, %v661_v50  ;;  %v552_v17 = vmul.f32 %v550_v49, %v550_v49  ;;  %v672_v23 = vmul.u32 %v1435_v30, %v618_v7 }
  0xef   : > { %v422_v6 = vsel %vm415_vm4, %v418_v55, %v421_v15  ;;  %vm674_vm9 = vc.u32 %v1508_v56, %v1516_v24  ;;  %v1030_v18 = vadd.s32 4294967169, %v738_v11  ;;  %v568_v25 = vadd.s32 3, %v551_v9 }
  0xf0   : > { %v423_v20 = vsel %vm412_vm6, nan, %v422_v6  ;;  %v675_v52 = vadd.s32 1, %v671_v28  ;;  %v553_v14 = vmul.f32 -0.001358992, %v552_v17  ;;  %v560_v21 = vmul.f32 -0.00019511016, %v552_v17 }
  0xf1   : > { %889 = vst [vmem:[#allocation2 + $0x10] sm:$0xff] %v423_v20  ;;  %v734_v1 = vand.u32 2147483647, %v1450_v62  ;;  %v744_v39 = vadd.s32 1, %v1030_v18  ;;  %v569_v37 = vand.u32 3, %v568_v25  ;;  %vm567_vm15 = vweird.f32 %v1216_v13 }
  0xf2   : > { %v676_v19 = vsel %vm674_vm9, %v675_v52, %v671_v28  ;;  %v554_v22 = vadd.f32 0.041655596, %v553_v14  ;;  %v561_v45 = vadd.f32 0.008332121, %v560_v21  ;;  %v673_v14 = vadd.s32 %v1516_v24, %v1508_v56 }
  0xf3   : > { %v677_v33 = vadd.s32 %v676_v19, %v672_v23  ;;  %vm745_vm10 = vcmp.gt.s32.totalorder %v744_v39, 0  ;;  %v741_v47 = vand.u32 8388607, %v734_v1  ;;  %vm570_vm11 = vcmp.lt.s32.totalorder %v569_v37, 2 }
  0xf4   : > { %v555_v32 = vmul.f32 %v554_v22, %v552_v17  ;;  %v562_v35 = vmul.f32 %v561_v45, %v552_v17  ;;  %v746_v40 = vsel %vm745_vm10, %v744_v39, 0  ;;  %vm571_vm12 = vcmp.eq.s32.totalorder %v569_v37, 0 }
  0xf5   : > { %v678_v12 = vadd.s32 536870912, %v677_v33  ;;  %v748_v59 = vand.u32 31, %v746_v40  ;;  %vm574_vm13 = vcmp.eq.s32.totalorder %v569_v37, 2  ;;  %v742_v34 = vor.u32 8388608, %v741_v47 }
  0xf6   : > { %v556_v41 = vadd.f32 -0.4999988, %v555_v32  ;;  %v563_v30 = vadd.f32 -0.16666654, %v562_v35  ;;  %v1540_v60 = vshrl.u32 %v746_v40, 5  ;;  %vm581_vm6 = vcmp.lt.s32.totalorder %v1236_v36, 0 }
  0xf7   : > { %v1535_v31 = vshrl.u32 %v678_v12, 30  ;;  %v1537_v16 = vsub.s32 32, %v748_v59  ;;  %v751_v50 = vshll.u32 %v1125_v42, %v748_v59  ;;  %v754_v29 = vshll.u32 %v1126_v44, %v748_v59 }
  0xf8   : > { %v557_v8 = vmul.f32 %v556_v41, %v552_v17  ;;  %v564_v38 = vmul.f32 %v563_v30, %v552_v17  ;;  %v760_v10 = vshll.u32 %v1128_v51, %v748_v59  ;;  %v757_v55 = vshll.u32 %v1127_v48, %v748_v59 }
  0xf9   : > { %v680_v61 = vshll.u32 %v1535_v31, 30  ;;  %v752_v63 = vshrl.u32 %v1126_v44, %v1537_v16  ;;  %v755_v0 = vshrl.u32 %v1127_v48, %v1537_v16  ;;  %v758_v3 = vshrl.u32 %v1128_v51, %v1537_v16 }
  0xfa   : > { %v558_v53 = vadd.f32 1.0, %v557_v8  ;;  %v565_v26 = vadd.f32 1.0, %v564_v38  ;;  %v761_v15 = vshrl.u32 %v1129_v54, %v1537_v16  ;;  %v764_v28 = vshrl.u32 %v1130_v57, %v1537_v16 }
  0xfb   : > { %v681_v46 = vsub.s32 %v677_v33, %v680_v61  ;;  %v1556_v11 = vor.u32 %v752_v63, %v751_v50  ;;  %v1558_v6 = vor.u32 %v755_v0, %v754_v29  ;;  %v1562_v17 = vor.u32 %v758_v3, %v757_v55 }
  0xfc   : > { %v566_v4 = vmul.f32 %v565_v26, %v550_v49  ;;  %v575_v5 = vxor.u32 2147483648, %v558_v53  ;;  %v762_v9 = vor.u32 %v761_v15, %v760_v10  ;;  %v763_v20 = vshll.u32 %v1129_v54, %v748_v59 }
  0xfd   : > { %vm682_vm14 = vcmp.lt.s32.totalorder %v681_v46, 0  ;;  %v683_v58 = vsub.s32 0, %v681_v46  ;;  %vm766_vm0 = vcmp.lt.s32.totalorder %v1540_v60, 1  ;;  %vm769_vm1 = vcmp.lt.s32.totalorder %v1540_v60, 4 }
  0xfe   : > { %v572_v43 = vxor.u32 2147483648, %v566_v4  ;;  %v576_v51 = vsel %vm574_vm13, %v575_v5, %v566_v4  ;;  %v765_v18 = vor.u32 %v764_v28, %v763_v20  ;;  %vm768_vm3 = vcmp.lt.s32.totalorder %v1540_v60, 3 }
  0xff   : > { %v684_v7 = vsel %vm682_vm14, %v683_v58, %v681_v46  ;;  %v774_v54 = vsel %vm766_vm0, %v1556_v11, %v1558_v6  ;;  %v775_v13 = vsel %vm769_vm1, %v762_v9, 920167782  ;;  %v1581_v25 = vshll.u32 %v742_v34, 8 }
 0x100   : > { %v685_v49 = vclz %v684_v7  ;;  %v573_v44 = vsel %vm571_vm12, %v558_v53, %v572_v43  ;;  %v776_v23 = vsel %vm768_vm3, %v1562_v17, %v775_v13  ;;  %vm767_vm4 = vcmp.lt.s32.totalorder %v1540_v60, 2 }
 0x101   : > { %v577_v48 = vsel %vm570_vm11, %v573_v44, %v576_v51  ;;  %v778_v22 = vsel %vm766_vm0, %v1558_v6, %v1562_v17  ;;  %v777_v45 = vsel %vm767_vm4, %v774_v54, %v776_v23  ;;  %v779_v56 = vsel %vm769_vm1, %v765_v18, 1326507024 }
 0x102   : > { %v1028_v52 = vadd.s32 4294967294, %v685_v49  ;;  %v578_v57 = vsel %vm567_vm15, nan, %v577_v48  ;;  %v780_v35 = vsel %vm768_vm3, %v762_v9, %v779_v56  ;;  %v783_v40 = vand.u32 65535, %v1581_v25 }
 0x103   : > { %890 = vst [vmem:[#allocation2] sm:$0xff] %v578_v57  ;;  %v781_v12 = vsel %vm767_vm4, %v778_v22, %v780_v35  ;;  %v807_v37 = vand.u32 65535, %v777_v45  ;;  %v808_v47 = vshrl.u32 %v777_v45, 16  ;;  %v784_v38 = vshrl.u32 %v1581_v25, 16 }
 0x104   : > { %vm1029_vm2 = vcmp.lt.s32.totalorder %v1028_v52, 0  ;;  %v785_v30 = vand.u32 65535, %v781_v12  ;;  %v786_v8 = vshrl.u32 %v781_v12, 16  ;;  %vm1600_vm5 = vcmp.le.f32.partialorder %v579_v27, 0.7853982 }
 0x105   : > { %v688_v21 = vsel %vm1029_vm2, 0, %v1028_v52  ;;  %v810_v61 = vmul.u32 %v808_v47, %v783_v40  ;;  %v809_v63 = vmul.u32 %v807_v37, %v783_v40  ;;  %v811_v0 = vmul.u32 %v807_v37, %v784_v38 }
 0x106   : > { %v689_v19 = vsub.s32 32, %v688_v21  ;;  %v693_v39 = vsub.s32 4294967266, %v688_v21  ;;  %v690_v24 = vshll.u32 %v681_v46, %v688_v21  ;;  %v788_v46 = vmul.u32 %v786_v8, %v783_v40 }
 0x107   : > { %v789_v34 = vmul.u32 %v785_v30, %v784_v38  ;;  %v813_v3 = vshll.u32 %v810_v61, 16  ;;  %v787_v58 = vmul.u32 %v785_v30, %v783_v40  ;;  %v790_v29 = vmul.u32 %v786_v8, %v784_v38 }
 0x108   : > { %v691_v33 = vshrl.u32 %v673_v14, %v689_v19  ;;  %v694_v32 = vadd.s32 127, %v693_v39  ;;  %v791_v50 = vshll.u32 %v788_v46, 16  ;;  %v812_v15 = vmul.u32 %v808_v47, %v784_v38 }
 0x109   : > { %v793_v10 = vshll.u32 %v789_v34, 16  ;;  %vm817_vm7 = vc.u32 %v809_v63, %v813_v3  ;;  %v815_v28 = vshll.u32 %v811_v0, 16  ;;  %v819_v49 = vadd.s32 %v813_v3, %v809_v63 }
 0x10a   : > { %v692_v59 = vor.u32 %v691_v33, %v690_v24  ;;  %v695_v41 = vshll.u32 %v694_v32, 23  ;;  %vm795_vm8 = vc.u32 %v787_v58, %v791_v50  ;;  %v797_v43 = vadd.s32 %v791_v50, %v787_v58 }
 0x10b   : > { %v818_v7 = vsel %vm817_vm7, 1, %v1124_v2  ;;  %v796_v55 = vsel %vm795_vm8, 1, %v1124_v2  ;;  %v703_v51 = vsub.s32 4, %v1535_v31  ;;  %v750_v48 = vshrl.u32 %v1125_v42, %v1537_v16 }
 0x10c   : > { %v696_v26 = vor.u32 4788187, %v695_v41  ;;  %v699_v5 = vcvt.s32.f32 %v692_v59  ;;  %v820_v9 = vadd.s32 %v818_v7, %v812_v15  ;;  %v798_v20 = vadd.s32 %v796_v55, %v790_v29 }
 0x10d   : > { %vm799_vm9 = vc.u32 %v797_v43, %v793_v10  ;;  %v771_v52 = vsel %vm769_vm1, %v1562_v17, 2102212464  ;;  %vm821_vm10 = vc.u32 %v819_v49, %v815_v28  ;;  %v792_v54 = vshrl.u32 %v788_v46, 16 }
 0x10e   : > { %v697_v4 = vand.u32 2147483647, %v696_v26  ;;  %v800_v57 = vsel %vm799_vm9, 1, %v1124_v2  ;;  %v822_v14 = vsel %vm821_vm10, 1, %v1124_v2  ;;  %v770_v42 = vsel %vm766_vm0, %v750_v48, %v1556_v11 }
 0x10f   : > { %v802_v13 = vadd.s32 %v800_v57, %v798_v20  ;;  %v814_v16 = vshrl.u32 %v810_v61, 16  ;;  %v824_v17 = vadd.s32 %v822_v14, %v820_v9  ;;  %v772_v19 = vsel %vm768_vm3, %v1558_v6, %v771_v52 }
 0x110   : > { %v700_v27 = vmul.f32 %v699_v5, %v697_v4  ;;  %v794_v39 = vshrl.u32 %v789_v34, 16  ;;  %v816_v45 = vshrl.u32 %v811_v0, 16  ;;  %v823_v32 = vadd.s32 %v819_v49, %v815_v28 }
 0x111   : > { %v803_v22 = vadd.s32 %v802_v13, %v792_v54  ;;  %v825_v56 = vadd.s32 %v824_v17, %v814_v16  ;;  %v704_v35 = vsel %vm581_vm6, %v703_v51, %v1535_v31  ;;  %v773_v11 = vsel %vm767_vm4, %v770_v42, %v772_v19 }
 0x112   : > { %v701_v44 = vxor.u32 2147483648, %v700_v27  ;;  %v706_v47 = vsel %vm1600_vm5, 0, %v704_v35  ;;  %v827_v30 = vmul.u32 %v1581_v25, %v773_v11  ;;  %vm722_vm0 = vweird.f32 %v1236_v36 }
 0x113   : > { %v804_v33 = vadd.s32 %v803_v22, %v794_v39  ;;  %v826_v12 = vadd.s32 %v825_v56, %v816_v45  ;;  %v723_v31 = vadd.s32 3, %v706_v47  ;;  %vm736_vm2 = vcmp.lt.s32.totalorder %v1450_v62, 0 }
 0x114   : > { %v702_v18 = vsel %vm581_vm6, %v701_v44, %v700_v27  ;;  %vm735_vm3 = vcmp.le.f32.partialorder %v734_v1, 0.7853982  ;;  %vm877_vm7 = vweird.f32 %v1450_v62 }
 0x115   : > { %v705_v21 = vsel %vm1600_vm5, %v1236_v36, %v702_v18  ;;  %vm829_vm11 = vc.u32 %v804_v33, %v823_v32  ;;  %v830_v6 = vadd.s32 1, %v826_v12  ;;  %v724_v4 = vand.u32 3, %v723_v31 }
 0x116   : > { %v707_v23 = vmul.f32 %v705_v21, %v705_v21  ;;  %v828_v9 = vadd.s32 %v823_v32, %v804_v33 }
 0x117   : > { %v831_v8 = vsel %vm829_vm11, %v830_v6, %v826_v12  ;;  %vm725_vm12 = vcmp.lt.s32.totalorder %v724_v4, 2  ;;  %vm726_vm13 = vcmp.eq.s32.totalorder %v724_v4, 0  ;;  %vm729_vm14 = vcmp.eq.s32.totalorder %v724_v4, 2 }
 0x118   : > { %v708_v2 = vmul.f32 -0.001358992, %v707_v23  ;;  %v715_v24 = vmul.f32 -0.00019511016, %v707_v23  ;;  %v832_v26 = vadd.s32 %v831_v8, %v827_v30 }
 0x11a   : > { %v709_v40 = vadd.f32 0.041655596, %v708_v2  ;;  %v716_v37 = vadd.f32 0.008332121, %v715_v24  ;;  %v833_v34 = vadd.s32 536870912, %v832_v26 }
 0x11c   : > { %v710_v59 = vmul.f32 %v709_v40, %v707_v23  ;;  %v717_v41 = vmul.f32 %v716_v37, %v707_v23  ;;  %v834_v3 = vshrl.u32 %v833_v34, 30 }
 0x11e   : > { %v711_v38 = vadd.f32 -0.4999988, %v710_v59  ;;  %v718_v61 = vadd.f32 -0.16666654, %v717_v41  ;;  %v835_v53 = vshll.u32 %v834_v3, 30  ;;  %v858_v16 = vsub.s32 4, %v834_v3 }
 0x120   : > { %v712_v46 = vmul.f32 %v711_v38, %v707_v23  ;;  %v719_v60 = vmul.f32 %v718_v61, %v707_v23  ;;  %v836_v29 = vsub.s32 %v832_v26, %v835_v53  ;;  %v859_v22 = vsel %vm736_vm2, %v858_v16, %v834_v3 }
 0x121   : > { %v861_v2 = vsel %vm735_vm3, 0, %v859_v22 }
 0x122   : > { %v713_v63 = vadd.f32 1.0, %v712_v46  ;;  %v720_v0 = vadd.f32 1.0, %v719_v60  ;;  %vm837_vm15 = vcmp.lt.s32.totalorder %v836_v29, 0  ;;  %v838_v15 = vsub.s32 0, %v836_v29 }
 0x123   : > { %v878_v11 = vadd.s32 3, %v861_v2 }
 0x124   : > { %v721_v5 = vmul.f32 %v720_v0, %v705_v21  ;;  %v730_v58 = vxor.u32 2147483648, %v713_v63  ;;  %v839_v7 = vsel %vm837_vm15, %v838_v15, %v836_v29 }
 0x125   : > { %v840_v55 = vclz %v839_v7  ;;  %v879_v6 = vand.u32 3, %v878_v11 }
 0x126   : > { %v727_v50 = vxor.u32 2147483648, %v721_v5  ;;  %v731_v10 = vsel %vm729_vm14, %v730_v58, %v721_v5 }
 0x127   : > { %v1031_v28 = vadd.s32 4294967294, %v840_v55  ;;  %vm881_vm4 = vcmp.eq.s32.totalorder %v879_v6, 0  ;;  %vm884_vm5 = vcmp.eq.s32.totalorder %v879_v6, 2  ;;  %vm880_vm6 = vcmp.lt.s32.totalorder %v879_v6, 2 }
 0x128   : > { %v728_v25 = vsel %vm726_vm13, %v713_v63, %v727_v50 }
 0x129   : > { %v732_v27 = vsel %vm725_vm12, %v728_v25, %v731_v10  ;;  %vm1032_vm1 = vcmp.lt.s32.totalorder %v1031_v28, 0 }
 0x12a   : > { %v733_v43 = vsel %vm722_vm0, nan, %v732_v27  ;;  %v843_v49 = vsel %vm1032_vm1, 0, %v1031_v28 }
 0x12b   : > { %891 = vst [vmem:[#allocation2 + $0x18] sm:$0xff] %v733_v43  ;;  %v844_v44 = vsub.s32 32, %v843_v49  ;;  %v848_v51 = vsub.s32 4294967266, %v843_v49  ;;  %v845_v20 = vshll.u32 %v836_v29, %v843_v49 }
 0x12d   : > { %v846_v48 = vshrl.u32 %v828_v9, %v844_v44  ;;  %v849_v52 = vadd.s32 127, %v848_v51 }
 0x12f   : > { %v847_v57 = vor.u32 %v846_v48, %v845_v20  ;;  %v850_v18 = vshll.u32 %v849_v52, 23 }
 0x131   : > { %v851_v54 = vor.u32 4788187, %v850_v18  ;;  %v854_v14 = vcvt.s32.f32 %v847_v57 }
 0x133   : > { %v852_v13 = vand.u32 2147483647, %v851_v54 }
 0x135   : > { %v855_v36 = vmul.f32 %v854_v14, %v852_v13 }
 0x137   : > { %v856_v21 = vxor.u32 2147483648, %v855_v36 }
 0x139   : > { %v857_v42 = vsel %vm736_vm2, %v856_v21, %v855_v36 }
 0x13a   : > { %v860_v17 = vsel %vm735_vm3, %v1450_v62, %v857_v42 }
 0x13b   : > { %v862_v23 = vmul.f32 %v860_v17, %v860_v17 }
 0x13d   : > { %v863_v19 = vmul.f32 -0.001358992, %v862_v23  ;;  %v870_v39 = vmul.f32 -0.00019511016, %v862_v23 }
 0x13f   : > { %v864_v45 = vadd.f32 0.041655596, %v863_v19  ;;  %v871_v56 = vadd.f32 0.008332121, %v870_v39 }
 0x141   : > { %v865_v24 = vmul.f32 %v864_v45, %v862_v23  ;;  %v872_v33 = vmul.f32 %v871_v56, %v862_v23 }
 0x143   : > { %v866_v32 = vadd.f32 -0.4999988, %v865_v24  ;;  %v873_v35 = vadd.f32 -0.16666654, %v872_v33 }
 0x145   : > { %v867_v12 = vmul.f32 %v866_v32, %v862_v23  ;;  %v874_v40 = vmul.f32 %v873_v35, %v862_v23 }
 0x147   : > { %v868_v37 = vadd.f32 1.0, %v867_v12  ;;  %v875_v1 = vadd.f32 1.0, %v874_v40 }
 0x149   : > { %v876_v47 = vmul.f32 %v875_v1, %v860_v17  ;;  %v885_v59 = vxor.u32 2147483648, %v868_v37 }
 0x14b   : > { %v882_v41 = vxor.u32 2147483648, %v876_v47  ;;  %v886_v8 = vsel %vm884_vm5, %v885_v59, %v876_v47 }
 0x14d   : > { %v883_v30 = vsel %vm881_vm4, %v868_v37, %v882_v41 }
 0x14e   : > { %v887_v38 = vsel %vm880_vm6, %v883_v30, %v886_v8 }
 0x14f   : > { %v888_v61 = vsel %vm877_vm7, nan, %v887_v38 }
 0x150   : > { %892 = vst [vmem:[#allocation2 + $0x8] sm:$0xff] %v888_v61 }
 0x151 PF: > { %v893_v26 = vld [vmem:[#allocation2 + $0x10] sm:$0xff]  ;;  %v894_v31 = vld [vmem:[#allocation2] sm:$0xff]  ;;  %v895_v46 = vld [vmem:[#allocation2 + $0x18] sm:$0xff] }
 0x152   : > { %897 = vst [vmem:[%s1191_s4] sm:$0xff] %v893_v26 }
 0x153   : > { %898 = vst [vmem:[%s1191_s4 + $0x8] sm:$0xff] %v894_v31 }
 0x154   : > { %899 = vst [vmem:[%s1191_s4 + $0x10] sm:$0xff] %v895_v46 }
 0x157   : > { %v896_v60 = vld [vmem:[#allocation2 + $0x8] sm:$0xff] }
 0x158   : > { %900 = vst [vmem:[%s1191_s4 + $0x18] sm:$0xff] %v896_v60 }
 0x159 PF: > { %s13_s16 = sadd.s32 1, %s1122_s16   ;;  %s1669_s12 = smov %s1114_s14 }
 0x15a   : > { %p10_p9 = scmp.ge.s32.totalorder %s13_s16, 6   ;;  %s1670_s13 = smov %s1118_s15 }
 0x15b   : > { %s1671_s14 = smov %s1674_s17  ;;  %s1672_s15 = smov %s1678_s18 }
 0x15c   :  { %12 = sbr.rel (!%p10_p9) target bundleno = 3 (0x3), region = 66 }

</bundles_post_ra>
